<compile_context>
chip_gen: v7x
topology: tpu7x:2x2x1
jax: 0.10.0
libtpu: 0.0.40
codegen_flags: <defaults>
</compile_context>

<pallas_src>
import functools

import numpy as np
import jax
import jax.numpy as jnp
from jax.experimental import pallas as pl
from jax.experimental.pallas import tpu as pltpu

LANE = 128      # f32 lane width of a vreg
SUBLANE = 8     # f32 sublane count of a vreg


def _round_up(x, m):
    return ((x + m - 1) // m) * m


# --------------------------------------------------------------------------
# Fused Pallas kernel: the whole LinearBlock stack in one body.
# refs = (x_ref, w0_ref, b0_ref, w1_ref, b1_ref, ..., o_ref)
# --------------------------------------------------------------------------
def _mlp_fused_kernel(*refs, n_layers):
    x_ref = refs[0]
    o_ref = refs[1 + 2 * n_layers]

    # Running activation stays on-chip between layers (compiler keeps it in
    # VMEM / vregs); it is never written back to HBM.
    h = x_ref[...]

    for l in range(n_layers):          # static Python loop -> fully unrolled
        w = refs[1 + 2 * l][...]       # (din_l, dout_l), pre-cast, resident
        b = refs[2 + 2 * l][...]       # (1, dout_l), f32, resident

        # MXU matmul in the weights' dtype (bf16 fast path by default),
        # accumulating in f32.
        y = jnp.dot(h.astype(w.dtype), w, preferred_element_type=jnp.float32)
        y = y + b.astype(jnp.float32)  # f32 epilogue
        if l != n_layers - 1:
            y = jnp.maximum(y, 0.0)    # ReLU on all but the last block
        h = y

    o_ref[...] = h.astype(o_ref.dtype)


# --------------------------------------------------------------------------
# Parameters
# --------------------------------------------------------------------------
def init_mlp_params(key, in_dim, out_dim, dim, n_blk, dtype=jnp.float32):
    """Synthetic parameters matching the PyTorch module shapes.

    Layer i: weight (out_i, in_i) [nn.Linear convention], bias (out_i,).
    """
    dims = [in_dim] + [dim] * (n_blk - 1) + [out_dim]
    params = []
    for i in range(n_blk):
        key, kw, kb = jax.random.split(key, 3)
        bound = 1.0 / float(dims[i]) ** 0.5
        w = jax.random.uniform(kw, (dims[i + 1], dims[i]), dtype,
                               minval=-bound, maxval=bound)
        b = jax.random.uniform(kb, (dims[i + 1],), dtype,
                               minval=-bound, maxval=bound)
        params.append((w, b))
    return params


def pack_mlp_params(raw_params, weight_dtype=jnp.bfloat16):
    """One-time packing: transpose weights to (in, out), pre-cast them to the
    compute dtype (bf16 by default), keep biases in f32 as (1, out), and pad
    ONLY the final layer's output dim up to a 128-lane multiple (for a
    lane-dense output store). Input/hidden dims are left un-padded."""
    ws, bs = [], []
    n = len(raw_params)
    for i, (w, b) in enumerate(raw_params):
        dout, din = w.shape
        w_t = w.T                                        # (din, dout)
        b_r = b.reshape(1, dout).astype(jnp.float32)
        if i == n - 1:
            dout_p = _round_up(dout, LANE)
            if dout_p != dout:
                w_t = jnp.pad(w_t, ((0, 0), (0, dout_p - dout)))
                b_r = jnp.pad(b_r, ((0, 0), (0, dout_p - dout)))
        ws.append(w_t.astype(weight_dtype))
        bs.append(b_r)
    return ws, bs


# --------------------------------------------------------------------------
# Forward
# --------------------------------------------------------------------------
def _choose_tile_b(B, cap):
    """Batch tile: multiple of 8 sublanes, balanced to minimize padding, and
    >= 2 grid steps when B > 8 so both v7x TensorCores participate."""
    if B <= SUBLANE:
        return SUBLANE            # tiny B: single step, all launch overhead
    n_tiles = max(2, pl.cdiv(B, cap))
    return _round_up(pl.cdiv(B, n_tiles), SUBLANE)


def mlp_forward(x, packed_params, out_dim, *, tile_b_cap=1024,
                out_dtype=None, return_padded=False):
    """Replicates MLP.forward: flatten to (B, -1), then the fused block stack.

    `return_padded=True` skips the post-call slice (large-B consumers can read
    the (b_pad, 128) buffer directly); `out_dtype=jnp.bfloat16` halves output
    writeback traffic when downstream tolerates bf16."""
    ws, bs = packed_params
    n_layers = len(ws)
    out_dtype = x.dtype if out_dtype is None else out_dtype

    B = x.shape[0]
    h = x.reshape(B, -1)                     # x.view(x.size(0), -1)
    in_dim = h.shape[1]
    assert in_dim == ws[0].shape[0], (in_dim, ws[0].shape)
    dL_pad = ws[-1].shape[1]                 # final Dout, padded to 128

    tile_b = _choose_tile_b(B, tile_b_cap)
    b_pad = _round_up(B, tile_b)
    if b_pad != B:
        h = jnp.pad(h, ((0, b_pad - B), (0, 0)))
    grid = (b_pad // tile_b,)

    # Input tile walks the batch; weights/biases use constant index_maps so
    # they stay resident in VMEM across the whole grid.
    in_specs = [pl.BlockSpec((tile_b, in_dim), lambda i: (i, 0))]
    operands = [h]
    for l in range(n_layers):
        din, dout = ws[l].shape
        in_specs.append(pl.BlockSpec((din, dout), lambda i: (0, 0)))
        in_specs.append(pl.BlockSpec((1, dout), lambda i: (0, 0)))
        operands.append(ws[l])
        operands.append(bs[l])

    # Cost estimate from the REAL (un-padded) dims.
    real_dims = [ws[l].shape[0] for l in range(n_layers)] + [out_dim]
    flops = 2 * B * sum(real_dims[i] * real_dims[i + 1]
                        for i in range(n_layers))
    bytes_accessed = (
        B * in_dim * np.dtype(x.dtype).itemsize
        + sum(real_dims[i] * real_dims[i + 1] * np.dtype(ws[i].dtype).itemsize
              for i in range(n_layers))
        + sum(real_dims[i + 1] * 4 for i in range(n_layers))
        + B * out_dim * np.dtype(out_dtype).itemsize)
    cost = pl.CostEstimate(flops=flops, transcendentals=0,
                           bytes_accessed=bytes_accessed)

    kernel = functools.partial(_mlp_fused_kernel, n_layers=n_layers)

    out_padded = pl.pallas_call(
        kernel,
        out_shape=jax.ShapeDtypeStruct((b_pad, dL_pad), out_dtype),
        grid_spec=pltpu.PrefetchScalarGridSpec(
            num_scalar_prefetch=0,
            grid=grid,
            in_specs=in_specs,
            out_specs=pl.BlockSpec((tile_b, dL_pad), lambda i: (i, 0)),
        ),
        compiler_params=pltpu.CompilerParams(
            # Batch axis is embarrassingly parallel -> shards across v7x's two
            # TensorCores (grid has >= 2 steps for B > 8); harmless on v5e/v6e.
            dimension_semantics=("parallel",),
        ),
        cost_estimate=cost,
    )(*operands)

    if return_padded:
        return out_padded
    # Strip batch padding and the 128-lane padding of the final layer.
    return out_padded[:B, :out_dim]


# --------------------------------------------------------------------------
# Plain-JAX reference for correctness checking
# --------------------------------------------------------------------------
def mlp_reference(x, raw_params):
    B = x.shape[0]
    h = x.reshape(B, -1).astype(jnp.float32)
    n = len(raw_params)
    for i, (w, b) in enumerate(raw_params):      # w: (out, in) torch layout
        h = h @ w.T.astype(jnp.float32) + b.astype(jnp.float32)
        if i != n - 1:
            h = jnp.maximum(h, 0.0)
    return h


if __name__ == "__main__":
    # Small shapes: input x of shape (2, 4, 4, 4) -> flattened in_dim = 64.
    B = 2
    in_dim = 4 * 4 * 4
    dim = 32
    out_dim = 8
    n_blk = 3

    key = jax.random.PRNGKey(0)
    kx, kp = jax.random.split(key)
    x = jax.random.normal(kx, (B, 4, 4, 4), dtype=jnp.float32)

    raw_params = init_mlp_params(kp, in_dim, out_dim, dim, n_blk)
    ref = mlp_reference(x, raw_params)

    # f32 packing: tight tolerance check.
    packed_f32 = pack_mlp_params(raw_params, weight_dtype=jnp.float32)
    out_f32 = jax.block_until_ready(mlp_forward(x, packed_f32, out_dim))
    assert out_f32.shape == (B, out_dim), out_f32.shape
    assert jnp.allclose(out_f32, ref, atol=1e-5, rtol=1e-5), (
        f"f32 path max abs err {jnp.max(jnp.abs(out_f32 - ref))}"
    )

    # bf16 packing (the default production fast path): looser tolerance.
    packed_bf16 = pack_mlp_params(raw_params)    # weight_dtype=bf16
    out_bf16 = jax.block_until_ready(mlp_forward(x, packed_bf16, out_dim))
    assert out_bf16.shape == (B, out_dim), out_bf16.shape
    assert jnp.allclose(out_bf16, ref, atol=3e-2, rtol=3e-2), (
        f"bf16 path max abs err {jnp.max(jnp.abs(out_bf16 - ref))}"
    )

    print("KERNEL_OK")
</pallas_src>

<mosaic_0001>
module attributes {stable_mosaic.version = 11 : i64} {
  func.func @_mlp_fused_kernel(%arg0: i32, %arg1: memref<8x64xf32, #tpu.memory_space<vmem>>, %arg2: memref<64x32xf32, #tpu.memory_space<vmem>>, %arg3: memref<1x32xf32, #tpu.memory_space<vmem>>, %arg4: memref<32x32xf32, #tpu.memory_space<vmem>>, %arg5: memref<1x32xf32, #tpu.memory_space<vmem>>, %arg6: memref<32x128xf32, #tpu.memory_space<vmem>>, %arg7: memref<1x128xf32, #tpu.memory_space<vmem>>, %arg8: memref<8x128xf32, #tpu.memory_space<vmem>>) attributes {dimension_semantics = [#tpu.dimension_semantics<parallel>], iteration_bounds = array<i64: 1>, scalar_prefetch = 0 : i64, scratch_operands = 0 : i64, tpu.core_type = #tpu.core_type<tc>, window_params = [{transform_indices = @transform_0, window_bounds = array<i64: 8, 64>}, {pipeline_mode = #tpu.pipeline_mode<synchronous>, transform_indices = @transform_1, window_bounds = array<i64: 64, 32>}, {pipeline_mode = #tpu.pipeline_mode<synchronous>, transform_indices = @transform_2, window_bounds = array<i64: 1, 32>}, {pipeline_mode = #tpu.pipeline_mode<synchronous>, transform_indices = @transform_3, window_bounds = array<i64: 32, 32>}, {pipeline_mode = #tpu.pipeline_mode<synchronous>, transform_indices = @transform_4, window_bounds = array<i64: 1, 32>}, {pipeline_mode = #tpu.pipeline_mode<synchronous>, transform_indices = @transform_5, window_bounds = array<i64: 32, 128>}, {pipeline_mode = #tpu.pipeline_mode<synchronous>, transform_indices = @transform_6, window_bounds = array<i64: 1, 128>}, {transform_indices = @transform_7, window_bounds = array<i64: 8, 128>}]} {
    %c0 = arith.constant 0 : index
    %c0_0 = arith.constant 0 : index
    %0 = vector.load %arg1[%c0, %c0_0] : memref<8x64xf32, #tpu.memory_space<vmem>>, vector<8x64xf32>
    %c0_1 = arith.constant 0 : index
    %c0_2 = arith.constant 0 : index
    %1 = vector.load %arg2[%c0_1, %c0_2] : memref<64x32xf32, #tpu.memory_space<vmem>>, vector<64x32xf32>
    %c0_3 = arith.constant 0 : index
    %c0_4 = arith.constant 0 : index
    %2 = vector.load %arg3[%c0_3, %c0_4] : memref<1x32xf32, #tpu.memory_space<vmem>>, vector<1x32xf32>
    %cst = arith.constant dense<0.000000e+00> : vector<8x32xf32>
    %3 = tpu.matmul %0, %1, %cst {dimension_numbers = #tpu.dot_dimension_numbers<[1], [0], [0], [1], [0, 0, 1, 1], [], []>} : vector<8x64xf32>, vector<64x32xf32>, vector<8x32xf32> -> vector<8x32xf32>
    %4 = vector.broadcast %2 : vector<1x32xf32> to vector<8x32xf32>
    %5 = arith.addf %3, %4 : vector<8x32xf32>
    %cst_5 = arith.constant 0.000000e+00 : f32
    %6 = vector.broadcast %cst_5 : f32 to vector<8x32xf32>
    %7 = arith.maximumf %5, %6 : vector<8x32xf32>
    %c0_6 = arith.constant 0 : index
    %c0_7 = arith.constant 0 : index
    %8 = vector.load %arg4[%c0_6, %c0_7] : memref<32x32xf32, #tpu.memory_space<vmem>>, vector<32x32xf32>
    %c0_8 = arith.constant 0 : index
    %c0_9 = arith.constant 0 : index
    %9 = vector.load %arg5[%c0_8, %c0_9] : memref<1x32xf32, #tpu.memory_space<vmem>>, vector<1x32xf32>
    %cst_10 = arith.constant dense<0.000000e+00> : vector<8x32xf32>
    %10 = tpu.matmul %7, %8, %cst_10 {dimension_numbers = #tpu.dot_dimension_numbers<[1], [0], [0], [1], [0, 0, 1, 1], [], []>} : vector<8x32xf32>, vector<32x32xf32>, vector<8x32xf32> -> vector<8x32xf32>
    %11 = vector.broadcast %9 : vector<1x32xf32> to vector<8x32xf32>
    %12 = arith.addf %10, %11 : vector<8x32xf32>
    %cst_11 = arith.constant 0.000000e+00 : f32
    %13 = vector.broadcast %cst_11 : f32 to vector<8x32xf32>
    %14 = arith.maximumf %12, %13 : vector<8x32xf32>
    %c0_12 = arith.constant 0 : index
    %c0_13 = arith.constant 0 : index
    %15 = vector.load %arg6[%c0_12, %c0_13] : memref<32x128xf32, #tpu.memory_space<vmem>>, vector<32x128xf32>
    %c0_14 = arith.constant 0 : index
    %c0_15 = arith.constant 0 : index
    %16 = vector.load %arg7[%c0_14, %c0_15] : memref<1x128xf32, #tpu.memory_space<vmem>>, vector<1x128xf32>
    %cst_16 = arith.constant dense<0.000000e+00> : vector<8x128xf32>
    %17 = tpu.matmul %14, %15, %cst_16 {dimension_numbers = #tpu.dot_dimension_numbers<[1], [0], [0], [1], [0, 0, 1, 1], [], []>} : vector<8x32xf32>, vector<32x128xf32>, vector<8x128xf32> -> vector<8x128xf32>
    %18 = vector.broadcast %16 : vector<1x128xf32> to vector<8x128xf32>
    %19 = arith.addf %17, %18 : vector<8x128xf32>
    %c0_17 = arith.constant 0 : index
    %c0_18 = arith.constant 0 : index
    %20 = vector.load %arg8[%c0_17, %c0_18] : memref<8x128xf32, #tpu.memory_space<vmem>>, vector<8x128xf32>
    tpu.vector_store %arg8[%c0_17, %c0_18], %19 {strides = array<i32>} : memref<8x128xf32, #tpu.memory_space<vmem>>, vector<8x128xf32>,
    return
  }
  func.func @transform_0(%arg0: i32) -> (i32, i32) {
    %c0_i32 = arith.constant 0 : i32
    %c0_i32_0 = arith.constant 0 : i32
    return %arg0, %c0_i32 : i32, i32
  }
  func.func @transform_1(%arg0: i32) -> (i32, i32) {
    %c0_i32 = arith.constant 0 : i32
    %c0_i32_0 = arith.constant 0 : i32
    %c0_i32_1 = arith.constant 0 : i32
    return %c0_i32, %c0_i32_0 : i32, i32
  }
  func.func @transform_2(%arg0: i32) -> (i32, i32) {
    %c0_i32 = arith.constant 0 : i32
    %c0_i32_0 = arith.constant 0 : i32
    %c0_i32_1 = arith.constant 0 : i32
    return %c0_i32, %c0_i32_0 : i32, i32
  }
  func.func @transform_3(%arg0: i32) -> (i32, i32) {
    %c0_i32 = arith.constant 0 : i32
    %c0_i32_0 = arith.constant 0 : i32
    %c0_i32_1 = arith.constant 0 : i32
    return %c0_i32, %c0_i32_0 : i32, i32
  }
  func.func @transform_4(%arg0: i32) -> (i32, i32) {
    %c0_i32 = arith.constant 0 : i32
    %c0_i32_0 = arith.constant 0 : i32
    %c0_i32_1 = arith.constant 0 : i32
    return %c0_i32, %c0_i32_0 : i32, i32
  }
  func.func @transform_5(%arg0: i32) -> (i32, i32) {
    %c0_i32 = arith.constant 0 : i32
    %c0_i32_0 = arith.constant 0 : i32
    %c0_i32_1 = arith.constant 0 : i32
    return %c0_i32, %c0_i32_0 : i32, i32
  }
  func.func @transform_6(%arg0: i32) -> (i32, i32) {
    %c0_i32 = arith.constant 0 : i32
    %c0_i32_0 = arith.constant 0 : i32
    %c0_i32_1 = arith.constant 0 : i32
    return %c0_i32, %c0_i32_0 : i32, i32
  }
  func.func @transform_7(%arg0: i32) -> (i32, i32) {
    %c0_i32 = arith.constant 0 : i32
    %c0_i32_0 = arith.constant 0 : i32
    return %arg0, %c0_i32 : i32, i32
  }
}

</mosaic_0001>

<bundles_post_ra>
// kernel: tpu_custom_call.1
= control target key start
LH: loop header
LB: loop body
LE: loop exit
PB: predicated region body
PF: predicated region fallthrough
CT: control target
= control target key end

     0   :  { %v421_v3 = vmov 0.0|0.0   ;;  %vm422_vm0 = vmmov 0   ;;  %v423_v6 = vmov 0.0   ;;  %s542_s0 = inlined_call_operand.vmem [shape: f32[8,64], index: 0, kind: input, shape index: {}]   ;;  %s543_s1 = inlined_call_operand.vmem [shape: f32[64,32], index: 1, kind: input, shape index: {}]   ;;  %s544_s2 = inlined_call_operand.vmem [shape: f32[1,32], index: 2, kind: input, shape index: {}]   ;;  %s545_s3 = inlined_call_operand.vmem [shape: f32[32,32], index: 3, kind: input, shape index: {}]   ;;  %s546_s4 = inlined_call_operand.vmem [shape: f32[1,32], index: 4, kind: input, shape index: {}]   ;;  %s547_s5 = inlined_call_operand.vmem [shape: f32[32,128], index: 5, kind: input, shape index: {}]   ;;  %s548_s6 = inlined_call_operand.vmem [shape: f32[1,128], index: 6, kind: input, shape index: {}]   ;;  %s549_s7 = inlined_call_operand.hbm [shape: f32[8,128], index: 7, kind: output, shape index: {}]  }
   0x1   :  { %v28_v0 = vld [vmem:[%s543_s1] sm:$0xff]  ;;  %v29_v1 = vld [vmem:[%s543_s1 + $0x8] sm:$0xff]  ;;  %v30_v2 = vld [vmem:[%s543_s1 + $0x10] sm:$0xff]  ;;  %369 = vmatprep.subr.bf16.mxu0 %v421_v3  ;;  %344 = vmatprep.mubr.msk.f32.mxu0 %vm422_vm0, %v423_v6 }
   0x2   :  { %v370_v4 = vpack.c.bf16 %v29_v1, %v28_v0  ;;  %v31_v5 = vld [vmem:[%s543_s1 + $0x18] sm:$0xff]  ;;  %381 = vmatprep.subr.bf16.mxu1 %v421_v3  ;;  %355 = vmatprep.mubr.msk.f32.mxu1 %vm422_vm0, %v423_v6  ;;  %v118_v8 = vld [vmem:[%s545_s3] sm:$0xff]  ;;  %v119_v9 = vld [vmem:[%s545_s3 + $0x8] sm:$0xff] }
   0x3   :  { %v373_v7 = vpack.c.bf16 %v31_v5, %v30_v2  ;;  %v32_v10 = vld [vmem:[%s543_s1 + $0x20] sm:$0xff]  ;;  %v33_v11 = vld [vmem:[%s543_s1 + $0x28] sm:$0xff]  ;;  %v382_v12 = vpack.c.bf16 %v119_v9, %v118_v8 }
   0x4   :  { %371 = vmatpush3.bf16.msra.mxu0 %v370_v4 }
   0x5   :  { %372 = vmatprep.subr.bf16.mxu0 %v421_v3 }
   0x6   :  { %12 = vsyncpa [#allocation3], 0  ;;  %383 = vmatpush3.bf16.msra.mxu1 %v382_v12  ;;  %v376_v13 = vpack.c.bf16 %v33_v11, %v32_v10  ;;  %v34_v14 = vld [vmem:[%s543_s1 + $0x30] sm:$0xff]  ;;  %v35_v15 = vld [vmem:[%s543_s1 + $0x38] sm:$0xff]  ;;  %vm43_vm1 = vcmask 523264   ;;  %vm129_vm2 = vcmask 261120  }
   0x7   :  { %384 = vmatprep.subr.bf16.mxu1 %v421_v3  ;;  %v379_v16 = vpack.c.bf16 %v35_v15, %v34_v14  ;;  %v27_v17 = vld [vmem:[%s542_s0] sm:$0xff]  ;;  %v120_v18 = vld [vmem:[%s545_s3 + $0x10] sm:$0xff]  ;;  %v121_v19 = vld [vmem:[%s545_s3 + $0x18] sm:$0xff]  ;;  %s424_s14 = smov [#allocation2]  }
   0x8   :  { %374 = vmatpush3.bf16.msra.mxu0 %v373_v7  ;;  %v385_v20 = vpack.c.bf16 %v121_v19, %v120_v18  ;;  %v303_v21 = vld [vmem:[%s544_s2] ss:$0 sm:$0xff]  ;;  %v205_v23 = vld [vmem:[%s547_s5 + $0x8] sm:$0xff]  ;;  %v206_v29 = vld [vmem:[%s547_s5 + $0x10] sm:$0xff]  ;;  %s295_s15 = sshll.u32 %s424_s14, 4  ;;  %s296_s15 = int_to_ptr.vmem [resolvable:$true] %s295_s15 }
   0x9   :  { %375 = vmatprep.subr.bf16.mxu0 %v421_v3  ;;  %v204_v22 = vld [vmem:[%s547_s5] sm:$0xff]  ;;  %v207_v30 = vld [vmem:[%s547_s5 + $0x18] sm:$0xff]  ;;  %s397_s5 = scalar_lea.vmem %s296_s15, 128  ;;  %p402_p1 = scmp.lt.s32.totalorder %s296_s15, %s296_s15 }
   0xa   :  { %386 = vmatpush3.bf16.msra.mxu1 %v385_v20  ;;  %v388_v27 = vpack.c.bf16 %v205_v23, %v204_v22  ;;  %v391_v31 = vpack.c.bf16 %v207_v30, %v206_v29  ;;  %v305_v32 = vld [vmem:[%s546_s4] ss:$0 sm:$0xff]  ;;  %p398_p0 = scmp.ne.s32.totalorder %s296_s15, %s397_s5  ;;  %p403_p2 = scmp.lt.s32.totalorder %s397_s5, %s397_s5 }
   0xb   :  { %387 = vmatprep.subr.bf16.mxu1 %v421_v3  ;;  %v307_v37 = vld [vmem:[%s548_s6] ss:$0 sm:$0xff] }
   0xc   :  { %377 = vmatpush3.bf16.msra.mxu0 %v376_v13  ;;  %p404_p3 = por %p403_p2, %p402_p1 }
   0xd   :  { %378 = vmatprep.subr.bf16.mxu0 %v421_v3 }
   0xe   :  { %p405_p4 = pnand %p404_p3, %p398_p0 }
  0x10   :  { %380 = vmatpush3.bf16.msra.mxu0 %v379_v16 }
  0x13   :  { %345 = vmatmul.mubr.msk.f32.vlgmr.msra.gmra.mrb[0].mxu0 %vm43_vm1, %v27_v17 }
  0xe6   :  { %v113_v24 = vpop.f32.mrb[0].mxu0 }
  0xe7   :  { %v114_v25 = vadd.f32 %v303_v21, %v113_v24  ;;  %v346_v26 = vpop.f32.mrb[1].mxu0 }
  0xe9   :  { %v117_v28 = vmax.f32 %v114_v25, 0.0 }
  0xeb   :  { %356 = vmatmul.mubr.msk.f32.vlgmr.msra.gmra.mrb[0].mxu1 %vm129_vm2, %v117_v28 }
  0xec   :  { %389 = vmatpush3.bf16.msra.mxu1 %v388_v27  ;;  %366 = vmatprep.mubr.msk.f32.mxu1 %vm422_vm0, %v423_v6 }
  0xed   :  { %390 = vmatprep.subr.bf16.mxu1 %v421_v3 }
  0xf0   :  { %392 = vmatpush3.bf16.msra.mxu1 %v391_v31 }
 0x1be   :  { %v199_v33 = vpop.f32.mrb[0].mxu1 }
 0x1bf   :  { %v200_v34 = vadd.f32 %v305_v32, %v199_v33  ;;  %v357_v35 = vpop.f32.mrb[1].mxu1 }
 0x1c1   :  { %v203_v36 = vmax.f32 %v200_v34, 0.0 }
 0x1c3   :  { %367 = vmatmul.mubr.msk.f32.vlgmr.msra.gmra.mrb[2].mxu1 %vm129_vm2, %v203_v36 }
 0x296   :  { %v284_v38 = vpop.f32.mrb[2].mxu1 }
 0x297   :  { %v285_v39 = vadd.f32 %v307_v37, %v284_v38  ;;  %v368_v40 = vpop.f32.mrb[3].mxu1 }
 0x299   :  { %288 = vst [vmem:[#allocation2] sm:$0xff] %v285_v39 }
 0x29a   :  { %408 = shalt.err (!%p405_p4)
}
 0x29b   :  { %s409_s17 = scalar_lea.hbm %s549_s7, 128 }
 0x29c   :  { %p410_p5 = scmp.ne.s32.totalorder %s549_s7, %s409_s17  ;;  %p413_p6 = scmp.lt.u32.totalorder %s409_s17, %s549_s7 }
 0x29e   :  { %p415_p7 = pnand %p413_p6, %p410_p5 }
 0x2a0   :  { %418 = shalt.err (!%p415_p7)
}
 0x2a1   :  { %298 = dma.vmem_to_hbm [thread:$0]  %s296_s15, 128, %s549_s7, [#allocation3]  }
 0x2a2   :  { %419 = dma.done.wait [#allocation3], 128  }
 0x2a3   :  { %420 = vsyncadd [#allocation3], 4294967168 }
 0x2a4   :  { %302 = vsyncpa [#allocation3], 1 }

</bundles_post_ra>
